<compile_context>
chip_gen: v5e
topology: v5e:2x2
jax: 0.10.0
libtpu: 0.0.40
codegen_flags: <defaults>
</compile_context>

<pallas_src>
import functools

import jax
import jax.numpy as jnp
from jax.experimental import pallas as pl
from jax.experimental.pallas import tpu as pltpu

NEG_SLOPE = 0.01   # torch.nn.LeakyReLU default negative_slope


def conv_block_kernel(x_ref, w_ref, b_ref, o_ref, *, cin):
    # x_ref: (1, H, W*Cin)          bf16, packed rows of one batch element
    # w_ref: (3*(W+2)*Cin, W*Cout)  bf16, banded/folded conv weights
    # b_ref: (1, W*Cout)            f32, bias tiled over w
    # o_ref: (1, H, W*Cout)         bf16, packed output rows
    H = o_ref.shape[1]

    # Zero-fill the 1-pixel spatial halo in-register (value concatenation):
    # one packed column (Cin lanes) left/right, one row top/bottom.  This
    # replaces the wrapper-level full-tensor jnp.pad HBM pass.
    core = x_ref[0]                                           # (H, W*Cin)
    zc = jnp.zeros((H, cin), core.dtype)
    row = jnp.concatenate([zc, core, zc], axis=-1)            # (H, (W+2)*Cin)
    zr = jnp.zeros((1, row.shape[-1]), core.dtype)
    xt = jnp.concatenate([zr, row, zr], axis=0)               # (H+2, (W+2)*Cin)

    # im2col over dh only: the (dw, ci) taps are already adjacent on the lane
    # axis, so concatenating the 3 row-shifted views yields the full patch
    # matrix as a value - no VMEM scratch, no masked stores.
    patch = jnp.concatenate([xt[dh:dh + H, :] for dh in range(3)], axis=-1)

    acc = jnp.dot(patch, w_ref[...], preferred_element_type=jnp.float32)
    acc = acc + b_ref[...]
    acc = jnp.where(acc > 0, acc, NEG_SLOPE * acc)            # LeakyReLU(0.01)
    o_ref[0] = acc.astype(o_ref.dtype)                        # lane-dense store


def conv_block(x_nchw, w_oihw, bias):
    """ConvBlock forward: Conv2d(3x3, pad=1) + LeakyReLU. NCHW in / NCHW out."""
    N, Cin, H, W = x_nchw.shape
    Cout = w_oihw.shape[0]
    K = 3 * (W + 2) * Cin
    L_out = W * Cout

    # TODO(synk): this banded-weight formulation targets the small-channel /
    # small-width regime (K x (W*Cout) weights and one full image per grid
    # step must fit VMEM); large C/H/W should fall back to a channel-on-lanes
    # im2col with haloed row tiles (pl.ANY + manual DMA).

    # Pack (w, ci) jointly onto the lane axis (single layout pass, bf16).
    x_pk = jnp.transpose(x_nchw, (0, 2, 3, 1)).reshape(N, H, W * Cin)
    x_pk = x_pk.astype(jnp.bfloat16)

    # Banded weight matrix:  A[(dh, wp, ci), (w, co)] = W[co, ci, dh, wp - w]
    # for wp - w in {0, 1, 2}, else 0.  Matches the in-kernel patch ordering
    # k = dh*(W+2)*Cin + wp*Cin + ci and packed output column w*Cout + co.
    wt = jnp.transpose(w_oihw, (2, 3, 1, 0)).astype(jnp.float32)   # (3,3,Cin,Cout)
    dw_i = jnp.arange(3)[:, None, None]
    wp_i = jnp.arange(W + 2)[None, :, None]
    w_i = jnp.arange(W)[None, None, :]
    sel = (wp_i == w_i + dw_i).astype(jnp.float32)                 # (3, W+2, W)
    w_band = jnp.einsum('hdic,dvw->hviwc', wt, sel)
    w_band = w_band.reshape(K, L_out).astype(jnp.bfloat16)

    b_pk = jnp.tile(bias.astype(jnp.float32), W).reshape(1, L_out)

    # VMEM budget derived from the actual (double-buffered) blocks + headroom.
    x_blk = H * W * Cin * 2
    o_blk = H * L_out * 2
    w_blk = K * L_out * 2
    b_blk = L_out * 4
    block_bytes = 2 * (x_blk + o_blk + b_blk) + 2 * w_blk
    vmem_limit = int(min(64 * 2**20, max(4 * 2**20, 8 * block_bytes)))

    out_pk = pl.pallas_call(
        functools.partial(conv_block_kernel, cin=Cin),
        out_shape=jax.ShapeDtypeStruct((N, H, L_out), jnp.bfloat16),
        grid_spec=pltpu.PrefetchScalarGridSpec(
            num_scalar_prefetch=0,
            grid=(N,),
            in_specs=[
                pl.BlockSpec((1, H, W * Cin), lambda n: (n, 0, 0)),
                pl.BlockSpec((K, L_out), lambda n: (0, 0)),      # grid-invariant
                pl.BlockSpec((1, L_out), lambda n: (0, 0)),      # grid-invariant
            ],
            out_specs=pl.BlockSpec((1, H, L_out), lambda n: (n, 0, 0)),
        ),
        compiler_params=pltpu.CompilerParams(
            dimension_semantics=("parallel",),
            vmem_limit_bytes=vmem_limit,
        ),
    )(x_pk, w_band, b_pk)

    # Unpack: (N, H, W*Cout) view -> (N, H, W, Cout) -> NCHW (one layout pass).
    out = out_pk.reshape(N, H, W, Cout)
    return jnp.transpose(out, (0, 3, 1, 2)).astype(x_nchw.dtype)


if __name__ == "__main__":
    in_channels, out_channels = 4, 8
    N, H, W = 2, 16, 16

    key = jax.random.PRNGKey(0)
    kx, kw, kb = jax.random.split(key, 3)

    # Deterministic parameter init (mimics PyTorch's uniform(-1/sqrt(fan_in), ...)).
    fan_in = in_channels * 3 * 3
    bound = 1.0 / (fan_in ** 0.5)
    x = jax.random.normal(kx, (N, in_channels, H, W), dtype=jnp.float32)
    w = jax.random.uniform(kw, (out_channels, in_channels, 3, 3),
                           minval=-bound, maxval=bound, dtype=jnp.float32)
    b = jax.random.uniform(kb, (out_channels,),
                           minval=-bound, maxval=bound, dtype=jnp.float32)

    conv_fn = jax.jit(conv_block)
    out = jax.block_until_ready(conv_fn(x, w, b))

    # Reference (f32) conv + bias + LeakyReLU.  The kernel uses bf16 matmul
    # operands / bf16 output with f32 accumulation, so tolerance is loosened.
    ref = jax.lax.conv_general_dilated(
        x, w, window_strides=(1, 1), padding=((1, 1), (1, 1)),
        dimension_numbers=("NCHW", "OIHW", "NCHW")) + b[None, :, None, None]
    ref = jnp.where(ref > 0, ref, NEG_SLOPE * ref)

    assert out.shape == (N, out_channels, H, W)
    assert jnp.allclose(out, ref, atol=3e-2, rtol=3e-2)

    print("KERNEL_OK")
</pallas_src>

<mosaic_0001>
module attributes {stable_mosaic.version = 11 : i64} {
  func.func @conv_block_kernel(%arg0: i32, %arg1: memref<1x16x64xbf16, #tpu.memory_space<vmem>>, %arg2: memref<216x128xbf16, #tpu.memory_space<vmem>>, %arg3: memref<1x128xf32, #tpu.memory_space<vmem>>, %arg4: memref<1x16x128xbf16, #tpu.memory_space<vmem>>) attributes {dimension_semantics = [#tpu.dimension_semantics<parallel>], iteration_bounds = array<i64: 2>, scalar_prefetch = 0 : i64, scratch_operands = 0 : i64, tpu.core_type = #tpu.core_type<tc>, window_params = [{transform_indices = @transform_0, window_bounds = array<i64: 1, 16, 64>}, {pipeline_mode = #tpu.pipeline_mode<synchronous>, transform_indices = @transform_1, window_bounds = array<i64: 216, 128>}, {pipeline_mode = #tpu.pipeline_mode<synchronous>, transform_indices = @transform_2, window_bounds = array<i64: 1, 128>}, {transform_indices = @transform_3, window_bounds = array<i64: 1, 16, 128>}]} {
    %c0 = arith.constant 0 : index
    %c0_0 = arith.constant 0 : index
    %c0_1 = arith.constant 0 : index
    %0 = vector.load %arg1[%c0, %c0_0, %c0_1] : memref<1x16x64xbf16, #tpu.memory_space<vmem>>, vector<1x16x64xbf16>
    %1 = vector.shape_cast %0 : vector<1x16x64xbf16> to vector<16x64xbf16>
    %cst = arith.constant 0.000000e+00 : bf16
    %2 = vector.broadcast %cst : bf16 to vector<16x4xbf16>
    %3 = tpu.concatenate %2, %1, %2 in 1 : vector<16x4xbf16>, vector<16x64xbf16>, vector<16x4xbf16> -> vector<16x72xbf16>
    %cst_2 = arith.constant 0.000000e+00 : bf16
    %4 = vector.broadcast %cst_2 : bf16 to vector<1x72xbf16>
    %5 = tpu.concatenate %4, %3, %4 in 0 : vector<1x72xbf16>, vector<16x72xbf16>, vector<1x72xbf16> -> vector<18x72xbf16>
    %6 = vector.extract_strided_slice %5 {offsets = [0, 0], sizes = [16, 72], strides = [1, 1]} : vector<18x72xbf16> to vector<16x72xbf16>
    %7 = vector.extract_strided_slice %5 {offsets = [1, 0], sizes = [16, 72], strides = [1, 1]} : vector<18x72xbf16> to vector<16x72xbf16>
    %8 = vector.extract_strided_slice %5 {offsets = [2, 0], sizes = [16, 72], strides = [1, 1]} : vector<18x72xbf16> to vector<16x72xbf16>
    %9 = tpu.concatenate %6, %7, %8 in 1 : vector<16x72xbf16>, vector<16x72xbf16>, vector<16x72xbf16> -> vector<16x216xbf16>
    %c0_3 = arith.constant 0 : index
    %c0_4 = arith.constant 0 : index
    %10 = vector.load %arg2[%c0_3, %c0_4] : memref<216x128xbf16, #tpu.memory_space<vmem>>, vector<216x128xbf16>
    %cst_5 = arith.constant dense<0.000000e+00> : vector<16x128xf32>
    %11 = tpu.matmul %9, %10, %cst_5 {dimension_numbers = #tpu.dot_dimension_numbers<[1], [0], [0], [1], [0, 0, 1, 1], [], []>} : vector<16x216xbf16>, vector<216x128xbf16>, vector<16x128xf32> -> vector<16x128xf32>
    %c0_6 = arith.constant 0 : index
    %c0_7 = arith.constant 0 : index
    %12 = vector.load %arg3[%c0_6, %c0_7] : memref<1x128xf32, #tpu.memory_space<vmem>>, vector<1x128xf32>
    %13 = vector.broadcast %12 : vector<1x128xf32> to vector<16x128xf32>
    %14 = arith.addf %11, %13 : vector<16x128xf32>
    %cst_8 = arith.constant 0.000000e+00 : f32
    %15 = vector.broadcast %cst_8 : f32 to vector<16x128xf32>
    %16 = arith.cmpf ogt, %14, %15 : vector<16x128xf32>
    %cst_9 = arith.constant 0.00999999977 : f32
    %17 = vector.broadcast %cst_9 : f32 to vector<16x128xf32>
    %18 = arith.mulf %17, %14 : vector<16x128xf32>
    %19 = arith.select %16, %14, %18 : vector<16x128xi1>, vector<16x128xf32>
    %20 = arith.truncf %19 : vector<16x128xf32> to vector<16x128xbf16>
    %c0_10 = arith.constant 0 : index
    %c0_11 = arith.constant 0 : index
    %c0_12 = arith.constant 0 : index
    %21 = vector.load %arg4[%c0_10, %c0_11, %c0_12] : memref<1x16x128xbf16, #tpu.memory_space<vmem>>, vector<1x16x128xbf16>
    %22 = vector.shape_cast %21 : vector<1x16x128xbf16> to vector<16x128xbf16>
    %23 = vector.shape_cast %20 : vector<16x128xbf16> to vector<1x16x128xbf16>
    tpu.vector_store %arg4[%c0_10, %c0_11, %c0_12], %23 {strides = array<i32>} : memref<1x16x128xbf16, #tpu.memory_space<vmem>>, vector<1x16x128xbf16>,
    return
  }
  func.func @transform_0(%arg0: i32) -> (i32, i32, i32) {
    %c0_i32 = arith.constant 0 : i32
    %c0_i32_0 = arith.constant 0 : i32
    %c0_i32_1 = arith.constant 0 : i32
    return %arg0, %c0_i32, %c0_i32_0 : i32, i32, i32
  }
  func.func @transform_1(%arg0: i32) -> (i32, i32) {
    %c0_i32 = arith.constant 0 : i32
    %c0_i32_0 = arith.constant 0 : i32
    %c0_i32_1 = arith.constant 0 : i32
    return %c0_i32, %c0_i32_0 : i32, i32
  }
  func.func @transform_2(%arg0: i32) -> (i32, i32) {
    %c0_i32 = arith.constant 0 : i32
    %c0_i32_0 = arith.constant 0 : i32
    %c0_i32_1 = arith.constant 0 : i32
    return %c0_i32, %c0_i32_0 : i32, i32
  }
  func.func @transform_3(%arg0: i32) -> (i32, i32, i32) {
    %c0_i32 = arith.constant 0 : i32
    %c0_i32_0 = arith.constant 0 : i32
    %c0_i32_1 = arith.constant 0 : i32
    return %arg0, %c0_i32, %c0_i32_0 : i32, i32, i32
  }
}

</mosaic_0001>

<bundles_post_ra>
// kernel: tile.8
= control target key start
LH: loop header
LB: loop body
LE: loop exit
PB: predicated region body
PF: predicated region fallthrough
CT: control target
= control target key end

     0   :  { %s28_s0 = inlined_call_operand.vmem [shape: f32[8], index: 0, kind: input, shape index: {}]   ;;  %s29_s1 = inlined_call_operand.vmem [shape: f32[16,8], index: 1, kind: output, shape index: {}]  }
   0x1   :  { %v4_v0 = vld [vmem:[%s28_s0] ss:$0 sm:$0xff] }
   0x2   :  { %5 = vst [vmem:[%s29_s1] sm:$0xff] %v4_v0 }
   0x3   :  { %8 = vst [vmem:[%s29_s1 + $0x8] sm:$0xff] %v4_v0 }

// kernel: tile.9
= control target key start
LH: loop header
LB: loop body
LE: loop exit
PB: predicated region body
PF: predicated region fallthrough
CT: control target
= control target key end

     0   :  { %s131_s10 = smov 120   ;;  %s132_s11 = smov 104   ;;  %vm3_vm0 = vcmask 64512   ;;  %vm9_vm1 = vcmask 1048512   ;;  %vm15_vm2 = vcmask 982912   ;;  %vm21_vm3 = vcmask 917312   ;;  %s207_s0 = inlined_call_operand.vmem [shape: f32[16,8], index: 0, kind: input, shape index: {}]   ;;  %s208_s1 = inlined_call_operand.vmem [shape: f32[1,128], index: 1, kind: output, shape index: {}]  }
   0x1   :  { %v101_v0 = vld [vmem:[%s207_s0 + $0xf] sm:$0x1]   ;;  %v103_v1 = vld [vmem:[%s207_s0 + $0xd] sm:$0x1]   ;;  %v105_v2 = vld [vmem:[%s207_s0 + $0xb] sm:$0x1]  }
   0x2   :  { %7 = vrot.lane.b32.xlu0 %v101_v0, %s131_s10  ;;  %19 = vrot.lane.b32.xlu1 %v103_v1, %s132_s11  ;;  %s133_s14 = smov 88   ;;  %v102_v3 = vld [vmem:[%s207_s0 + $0xe] sm:$0x1]   ;;  %v104_v4 = vld [vmem:[%s207_s0 + $0xc] sm:$0x1]   ;;  %s134_s19 = smov 112  }
   0x3   :  { %31 = vrot.lane.b32.xlu2 %v105_v2, %s133_s14  ;;  %s135_s20 = smov 96   ;;  %v106_v5 = vld [vmem:[%s207_s0 + $0xa] sm:$0x1]   ;;  %s136_s23 = smov 80   ;;  %v107_v6 = vld [vmem:[%s207_s0 + $0x9] sm:$0x1]  }
   0x4   :  { %v108_v7 = vld [vmem:[%s207_s0 + $0x8] sm:$0x1]   ;;  %s137_s28 = smov 72   ;;  %s138_s29 = smov 64   ;;  %v109_v8 = vld [vmem:[%s207_s0 + $0x7] sm:$0x1]  }
   0x5   :  { %s139_s3 = smov 56   ;;  %v110_v9 = vld [vmem:[%s207_s0 + $0x6] sm:$0x1]   ;;  %v111_v10 = vld [vmem:[%s207_s0 + $0x5] sm:$0x1]   ;;  %s140_s8 = smov 48  }
   0x6   :  { %s141_s9 = smov 40   ;;  %v112_v11 = vld [vmem:[%s207_s0 + $0x4] sm:$0x1]   ;;  %s142_s12 = smov 32   ;;  %v113_v12 = vld [vmem:[%s207_s0 + $0x3] sm:$0x1]  }
   0x7   :  { %v114_v13 = vld [vmem:[%s207_s0 + $0x2] sm:$0x1]   ;;  %s143_s17 = smov 24   ;;  %s144_s18 = smov 16   ;;  %v115_v14 = vld [vmem:[%s207_s0 + $0x1] sm:$0x1]  }
   0x8   :  { %s145_s21 = smov 8   ;;  %v2_v15 = vld [vmem:[%s207_s0] sm:$0x1]   ;;  %vm27_vm4 = vcmask 851712   ;;  %vm33_vm5 = vcmask 786112   ;;  %vm39_vm6 = vcmask 720512  }
   0x9   :  { %4 = vst.msk [vmem:[#allocation0] sm:$0x1] %vm3_vm0, %v2_v15   ;;  %vm45_vm7 = vcmask 654912   ;;  %vm51_vm8 = vcmask 589312   ;;  %vm57_vm9 = vcmask 523712   ;;  %vm63_vm10 = vcmask 458112  }
   0xa   :  { %13 = vrot.lane.b32.xlu0 %v102_v3, %s134_s19  ;;  %25 = vrot.lane.b32.xlu1 %v104_v4, %s135_s20  ;;  %vm69_vm11 = vcmask 392512   ;;  %vm75_vm12 = vcmask 326912   ;;  %vm81_vm13 = vcmask 261312   ;;  %vm87_vm14 = vcmask 195712  }
   0xb   :  { %37 = vrot.lane.b32.xlu2 %v106_v5, %s136_s23  ;;  %vm93_vm15 = vcmask 130112  }
  0x12   :  { %43 = vrot.lane.b32.xlu0 %v107_v6, %s137_s28  ;;  %49 = vrot.lane.b32.xlu1 %v108_v7, %s138_s29 }
  0x13   :  { %55 = vrot.lane.b32.xlu2 %v109_v8, %s139_s3 }
  0x1a   :  { %61 = vrot.lane.b32.xlu0 %v110_v9, %s140_s8  ;;  %67 = vrot.lane.b32.xlu1 %v111_v10, %s141_s9 }
  0x1b   :  { %73 = vrot.lane.b32.xlu2 %v112_v11, %s142_s12 }
  0x22   :  { %79 = vrot.lane.b32.xlu0 %v113_v12, %s143_s17  ;;  %85 = vrot.lane.b32.xlu1 %v114_v13, %s144_s18 }
  0x23   :  { %91 = vrot.lane.b32.xlu2 %v115_v14, %s145_s21 }
  0x5d   :  { %v32_v16 = vpop.permute.xlu2 %31  }
  0x65   :  { %v38_v17 = vpop.permute.xlu2 %37  }
  0x6d   :  { %v56_v18 = vpop.permute.xlu2 %55  }
  0x74   :  { %v8_v19 = vpop.permute.xlu0 %7   ;;  %v20_v20 = vpop.permute.xlu1 %19  }
  0x75   :  { %10 = vst.msk [vmem:[#allocation0] sm:$0x1] %vm9_vm1, %v8_v19   ;;  %v74_v21 = vpop.permute.xlu2 %73  }
  0x7c   :  { %v14_v22 = vpop.permute.xlu0 %13   ;;  %v26_v23 = vpop.permute.xlu1 %25  }
  0x7d   :  { %16 = vst.msk [vmem:[#allocation0] sm:$0x1] %vm15_vm2, %v14_v22   ;;  %v92_v24 = vpop.permute.xlu2 %91  }
  0x7e   :  { %22 = vst.msk [vmem:[#allocation0] sm:$0x1] %vm21_vm3, %v20_v20  }
  0x7f   :  { %28 = vst.msk [vmem:[#allocation0] sm:$0x1] %vm27_vm4, %v26_v23  }
  0x80   :  { %34 = vst.msk [vmem:[#allocation0] sm:$0x1] %vm33_vm5, %v32_v16  }
  0x81   :  { %40 = vst.msk [vmem:[#allocation0] sm:$0x1] %vm39_vm6, %v38_v17  }
  0x84   :  { %v44_v25 = vpop.permute.xlu0 %43   ;;  %v50_v26 = vpop.permute.xlu1 %49  }
  0x85   :  { %46 = vst.msk [vmem:[#allocation0] sm:$0x1] %vm45_vm7, %v44_v25  }
  0x86   :  { %52 = vst.msk [vmem:[#allocation0] sm:$0x1] %vm51_vm8, %v50_v26  }
  0x87   :  { %58 = vst.msk [vmem:[#allocation0] sm:$0x1] %vm57_vm9, %v56_v18  }
  0x8c   :  { %v62_v27 = vpop.permute.xlu0 %61   ;;  %v68_v28 = vpop.permute.xlu1 %67  }
  0x8d   :  { %64 = vst.msk [vmem:[#allocation0] sm:$0x1] %vm63_vm10, %v62_v27  }
  0x8e   :  { %70 = vst.msk [vmem:[#allocation0] sm:$0x1] %vm69_vm11, %v68_v28  }
  0x8f   :  { %76 = vst.msk [vmem:[#allocation0] sm:$0x1] %vm75_vm12, %v74_v21  }
  0x94   :  { %v80_v29 = vpop.permute.xlu0 %79   ;;  %v86_v30 = vpop.permute.xlu1 %85  }
  0x95   :  { %82 = vst.msk [vmem:[#allocation0] sm:$0x1] %vm81_vm13, %v80_v29  }
  0x96   :  { %88 = vst.msk [vmem:[#allocation0] sm:$0x1] %vm87_vm14, %v86_v30  }
  0x97   :  { %94 = vst.msk [vmem:[#allocation0] sm:$0x1] %vm93_vm15, %v92_v24  }
  0x9e   :  { %v97_v31 = vld [vmem:[#allocation0] sm:$0x1] }
  0x9f   :  { %100 = vst [vmem:[%s208_s1] sm:$0x1] %v97_v31 }

// kernel: conv_block.1
= control target key start
LH: loop header
LB: loop body
LE: loop exit
PB: predicated region body
PF: predicated region fallthrough
CT: control target
= control target key end

     0   :  { %s574_s12 = smov 0   ;;  %s643_s0 = inlined_call_operand.vmem [shape: bf16[2,16,64], index: 0, kind: input, shape index: {}]   ;;  %s644_s1 = inlined_call_operand.vmem [shape: bf16[216,128], index: 1, kind: input, shape index: {}]   ;;  %s645_s2 = inlined_call_operand.vmem [shape: f32[1,128], index: 2, kind: input, shape index: {}]   ;;  %s646_s3 = inlined_call_operand.vmem [shape: bf16[2,16,128], index: 3, kind: output, shape index: {}]  }
   0x1 LB: > { %s442_s13 = sadd.s32 4294967295, %s549_s12   ;;  %p446_p0 = scmp.ge.s32.totalorder %s549_s12, 1  ;;  %s549_s12 = sphi %s574_s12, %s13_s12  }
   0x2   : > { %p137_p1 = scmp.lt.s32.totalorder %s549_s12, 3 }
   0x4   : > { %p138_p2 = pnand %p446_p0, %p137_p1 }
   0x5   : > { %p161_p3 = scmp.lt.s32.totalorder (!%p138_p2), %s442_s13, 1  ;;  %s551_s18 = smov (!%p138_p2), 4  }
   0x6   : > { %141 = sbr.rel (%p138_p2) target bundleno = 406 (0x196), region = 32  ;;  %s552_s19 = smov (!%p138_p2), 16  }
   0x7   : > { %s553_s20 = smov (!%p138_p2), 72  }
   0xb   : > { %s648_s13 = smov (!%p161_p3, %s442_s13), 1  ;;  %v520_v1 = vld [vmem:[%s644_s1 + $0x38] sm:$0xff]  ;;  %v256_v2 = vld [vmem:[%s644_s1 + $0x68] sm:$0xf]  ;;  %v519_v3 = vld [vmem:[%s644_s1 + $0x30] sm:$0xff]  ;;  %vm345_vm0 = vcmask 1043456  }
   0xc   : > { %s510_s14 = sshll.u32 %s648_s13, 3  ;;  %349 = vmatpush.bf16.msra.mxu0 %v520_v1  ;;  %v314_v4 = vunpack.c.l.b16 %v256_v2  ;;  %v518_v6 = vld [vmem:[%s644_s1 + $0x28] sm:$0xff]  ;;  %v525_v8 = vld [vmem:[%s644_s1 + $0x60] sm:$0xff]  ;;  %v524_v10 = vld [vmem:[%s644_s1 + $0x58] sm:$0xff]  ;;  %vm181_vm1 = vcmask 31744   ;;  %vm185_vm2 = vcmask 556032  }
   0xd   : > { %s165_s17 = scalar_lea.vmem %s643_s0, %s510_s14  ;;  %v517_v9 = vld [vmem:[%s644_s1 + $0x20] sm:$0xff]  ;;  %v516_v11 = vld [vmem:[%s644_s1 + $0x18] sm:$0xff]  ;;  %v523_v13 = vld [vmem:[%s644_s1 + $0x50] sm:$0xff]  ;;  %vm195_vm3 = vcmask 1040384   ;;  %vm196_vm4 = vsmask.f32 256  ;;  %s170_s29 = scalar_lea.vmem %s646_s3, %s510_s14 }
   0xe   : > { %v512_v0 = vld [vmem:[%s165_s17] sm:$0xff]  ;;  %v328_v5 = vpack.c.b16 %v314_v4, %v314_v4  ;;  %v515_v17 = vld [vmem:[%s644_s1 + $0x10] sm:$0xff]  ;;  %vm197_vm5 = vmand %vm195_vm3, %vm196_vm4  ;;  %vm217_vm6 = vcmask 1046528   ;;  %vm200_vm7 = vsmask.f32 7424  ;;  %vm223_vm8 = vcmask 588800  }
   0xf   : > { %179 = vrot.lane.b32.xlu0 %v512_v0, %s551_s18  ;;  %v522_v18 = vld [vmem:[%s644_s1 + $0x48] sm:$0xff]  ;;  %v513_v35 = vld [vmem:[%s644_s1] sm:$0xff]  ;;  %vm227_vm9 = vcmask 130048   ;;  %vm342_vm10 = vcmask 719872  }
  0x10   : > { %350 = vmatpush.bf16.msra.mxu0 %v519_v3  ;;  %v347_v7 = vsel %vm345_vm0, %v328_v5, 0  ;;  %v514_v23 = vld [vmem:[%s644_s1 + $0x8] sm:$0xff]  ;;  %v521_v36 = vld [vmem:[%s644_s1 + $0x40] sm:$0xff] }
  0x11   : > { %365 = vmatpush.bf16.msra.mxu1 %v347_v7  ;;  %v542_v41 = vld [vmem:[%s645_s2] ss:$0 sm:$0xff] }
  0x14   : > { %351 = vmatpush.bf16.msra.mxu0 %v518_v6 }
  0x15   : > { %366 = vmatpush.bf16.msra.mxu1 %v525_v8 }
  0x18   : > { %352 = vmatpush.bf16.msra.mxu0 %v517_v9 }
  0x19   : > { %367 = vmatpush.bf16.msra.mxu1 %v524_v10 }
  0x1c   : > { %353 = vmatpush.bf16.msra.mxu0 %v516_v11 }
  0x1d   : > { %368 = vmatpush.bf16.msra.mxu1 %v523_v13 }
  0x20   : > { %354 = vmatpush.bf16.msra.mxu0 %v515_v17 }
  0x21   : > { %369 = vmatpush.bf16.msra.mxu1 %v522_v18 }
  0x24   : > { %355 = vmatpush.bf16.msra.mxu0 %v514_v23 }
  0x25   : > { %370 = vmatpush.bf16.msra.mxu1 %v521_v36 }
  0x28   : > { %356 = vmatpush.bf16.msra.mxu0 %v513_v35 }
  0x81   : > { %v180_v12 = vpop.permute.xlu0 %179 }
  0x82   : > { %v184_v14 = vsel %vm181_vm1, 0, %v180_v12 }
  0x83   : > { %v186_v15 = vsel %vm185_vm2, %v184_v14, 0 }
  0x84   : > { %v187_v16 = vshrl.u32 %v186_v15, 16  ;;  %v190_v20 = vshll.u32 %v186_v15, 16 }
  0x86   : > { %v189_v19 = vrot.slane %v187_v16, 7 }
  0x88   : > { %v192_v21 = vor.u32 %v190_v20, %v189_v19  ;;  %v199_v22 = vsel %vm197_vm5, %v189_v19, 0 }
  0x89   : > { %v209_v25 = vshll.u32 %v199_v22, 16  ;;  %v219_v27 = vrot.slane %v199_v22, 1 }
  0x8a   : > { %v198_v24 = vsel %vm197_vm5, 0, %v192_v21 }
  0x8b   : > { %v218_v26 = vrot.slane %v198_v24, 1  ;;  %v204_v28 = vshll.u32 %v198_v24, 16  ;;  %v202_v30 = vshrl.u32 %v198_v24, 16  ;;  %v211_v33 = vrot.slane %v209_v25, 1 }
  0x8d   : > { %v220_v29 = vsel %vm217_vm6, %v218_v26, %v219_v27  ;;  %v206_v31 = vrot.slane %v204_v28, 1 }
  0x8e   : > { %221 = vrot.lane.b32.xlu1 %v220_v29, %s552_s19 }
  0x8f   : > { %v207_v32 = vor.u32 %v206_v31, %v202_v30 }
  0x91   : > { %v212_v34 = vsel %vm200_vm7, %v207_v32, %v211_v33 }
  0x92   : > { %213 = vrot.lane.b32.xlu0 %v212_v34, %s553_s20 }
 0x100   : > { %v222_v37 = vpop.permute.xlu1 %221 }
 0x104   : > { %v214_v38 = vpop.permute.xlu0 %213 }
 0x105   : > { %v225_v39 = vsel %vm223_vm8, %v198_v24, %v214_v38  ;;  %v229_v40 = vsel %vm227_vm9, %v214_v38, %v222_v37 }
 0x106   : > { %357 = vmatmul.bf16.vlgmr.msra.gmra.mxu0 %v225_v39  ;;  %507 = vmatmul.msk.bf16.vlgmr.msra.gmra.mxu1 %vm342_vm10, %v229_v40 }
 0x183   : > { %v358_v42 = vpop.f32.mrf.mxu0  ;;  %v372_v43 = vpop.f32.mrf.mxu1 }
 0x184   : > { %v359_v44 = vadd.f32 %v542_v41, %v358_v42 }
 0x186   : > { %v373_v45 = vadd.f32 %v372_v43, %v359_v44 }
 0x188   : > { %v379_v49 = vmul.f32 0.01, %v373_v45  ;;  %vm377_vm11 = vcmp.gt.f32.partialorder %v373_v45, 0.0 }
 0x18a   : > { %v381_v52 = vsel %vm377_vm11, %v373_v45, %v379_v49 }
 0x18b   : > { %v360_v46 = vpop.f32.mrf.mxu0  ;;  %v374_v48 = vpop.f32.mrf.mxu1 }
 0x18c   : > { %v361_v47 = vadd.f32 %v542_v41, %v360_v46 }
 0x18e   : > { %v375_v50 = vadd.f32 %v374_v48, %v361_v47 }
 0x190   : > { %vm378_vm12 = vcmp.gt.f32.partialorder %v375_v50, 0.0  ;;  %v380_v51 = vmul.f32 0.01, %v375_v50 }
 0x192   : > { %v382_v53 = vsel %vm378_vm12, %v375_v50, %v380_v51 }
 0x193   : > { %v529_v54 = vpack.c.bf16 %v382_v53, %v381_v52 }
 0x195   : > { %530 = vst [vmem:[%s170_s29] sm:$0xff] %v529_v54  }
 0x196 PF: > { %s13_s12 = sadd.s32 1, %s549_s12  }
 0x197   : > { %p10_p4 = scmp.ge.s32.totalorder %s13_s12, 4  }
 0x199   :  { %12 = sbr.rel (!%p10_p4) target bundleno = 1 (0x1), region = 62 }

</bundles_post_ra>
